<compile_context>
chip_gen: v5e
topology: v5e:2x2
jax: 0.10.0
libtpu: 0.0.40
codegen_flags: <defaults>
</compile_context>

<pallas_src>
import functools

import jax
import jax.numpy as jnp
from jax import lax
from jax.experimental import pallas as pl
from jax.experimental.pallas import tpu as pltpu

EPS = 1e-5


# ----------------------------- Pallas kernels ------------------------------

def _ln_withbias_kernel(x_ref, w_ref, b_ref, o_ref):
    # WithBias_LayerNorm over the channel axis.
    # x_ref: (BB, C, TL) -- channels on sublanes, pixels on lanes.
    x = x_ref[...].astype(jnp.float32)
    inv_c = 1.0 / x.shape[1]
    mu = jnp.sum(x, axis=1, keepdims=True) * inv_c          # (BB, 1, TL)
    ex2 = jnp.sum(x * x, axis=1, keepdims=True) * inv_c     # single fused sweep
    var = ex2 - mu * mu                                      # biased variance
    y = (x - mu) * lax.rsqrt(var + EPS)                      # rsqrt on EUP
    w = w_ref[...].astype(jnp.float32)                       # (C, 1) -> bcast
    b = b_ref[...].astype(jnp.float32)
    o_ref[...] = (y * w + b).astype(o_ref.dtype)


def _ln_biasfree_kernel(x_ref, w_ref, o_ref):
    # BiasFree_LayerNorm: x / sqrt(var + eps) * w  (variance about the mean,
    # matching torch.var(unbiased=False); the output itself is not centered).
    x = x_ref[...].astype(jnp.float32)
    inv_c = 1.0 / x.shape[1]
    mu = jnp.sum(x, axis=1, keepdims=True) * inv_c
    ex2 = jnp.sum(x * x, axis=1, keepdims=True) * inv_c
    var = ex2 - mu * mu
    y = x * lax.rsqrt(var + EPS)
    w = w_ref[...].astype(jnp.float32)
    o_ref[...] = (y * w).astype(o_ref.dtype)


# --------------------------- tiling / VMEM budget ----------------------------

def _vmem_limit_and_block_budget():
    """Pick a scoped-VMEM limit and a per-block byte budget, generation-aware."""
    cap = 64 << 20                                   # conservative (v7x) default
    try:
        info = pltpu.get_tpu_info()
        cap = int(getattr(info, "vmem_capacity_bytes", cap)) or cap
    except Exception:
        pass
    # Request ~3/4 of physical VMEM (capped at 96 MiB): raises v5e/v6e's 16/32
    # MiB scoped default, stays inside v7x's 64 MiB part.
    limit = min((cap * 3) // 4, 96 << 20)
    # Per-block budget: double-buffered input + output plus f32 temporaries.
    max_block_bytes = limit // 8
    return limit, max_block_bytes


def _choose_blocks(B, C, L, itemsize, max_block_bytes):
    """Return (batch_block, lane_tile)."""
    elt = max(int(itemsize), 4)                      # f32 temporaries in-kernel
    lane_cap = max(128, ((max_block_bytes // (C * elt)) // 128) * 128)
    if L > lane_cap:
        # Large feature maps: one image per step, big lane-dense tile.
        return 1, lane_cap
    # Small feature maps: take the whole (H*W) per step and block over batch
    # so each step still moves several MiB.
    bb = max(1, min(B, max_block_bytes // max(1, C * L * elt)))
    if B >= 2:
        bb = min(bb, (B + 1) // 2)   # keep >= 2 parallel steps (v7x megacore)
    return bb, L


# ----------------------------- pallas_call wrapper ---------------------------

def layer_norm(x_nchw, weight, bias=None, layer_norm_type="WithBias"):
    """ZeroIIformer LayerNorm forward.  x_nchw: (B, C, H, W), weight/bias: (C,)."""
    B, C, H, W = x_nchw.shape
    L = H * W
    x3 = x_nchw.reshape(B, C, L)                 # free reshape, native NCHW layout

    limit, max_block_bytes = _vmem_limit_and_block_budget()
    bb, tl = _choose_blocks(B, C, L, x_nchw.dtype.itemsize, max_block_bytes)
    grid = (pl.cdiv(B, bb), pl.cdiv(L, tl))

    x_spec = pl.BlockSpec((bb, C, tl), lambda b, l: (b, 0, l))
    p_spec = pl.BlockSpec((C, 1), lambda b, l: (0, 0))     # per-channel params
    out_spec = pl.BlockSpec((bb, C, tl), lambda b, l: (b, 0, l))

    cparams = pltpu.CompilerParams(
        dimension_semantics=("parallel", "parallel"),
        vmem_limit_bytes=int(limit),
    )
    itemsize = x_nchw.dtype.itemsize
    cost = pl.CostEstimate(
        flops=int(8 * B * C * L),
        transcendentals=int(B * L),
        bytes_accessed=int(2 * B * C * L * itemsize + 2 * C * itemsize),
    )

    if layer_norm_type == "WithBias":
        out = pl.pallas_call(
            _ln_withbias_kernel,
            out_shape=jax.ShapeDtypeStruct((B, C, L), x_nchw.dtype),
            grid=grid,
            in_specs=[x_spec, p_spec, p_spec],
            out_specs=out_spec,
            compiler_params=cparams,
            cost_estimate=cost,
        )(x3, weight.reshape(C, 1), bias.reshape(C, 1))
    else:  # 'BiasFree'
        out = pl.pallas_call(
            _ln_biasfree_kernel,
            out_shape=jax.ShapeDtypeStruct((B, C, L), x_nchw.dtype),
            grid=grid,
            in_specs=[x_spec, p_spec],
            out_specs=out_spec,
            compiler_params=cparams,
            cost_estimate=cost,
        )(x3, weight.reshape(C, 1))

    return out.reshape(B, C, H, W)


# ----------------------------- pure-JAX reference ----------------------------

def _layer_norm_ref(x, w, b=None, layer_norm_type="WithBias"):
    # Mirrors the PyTorch module: to_3d -> LN over C -> to_4d.
    B, C, H, W = x.shape
    x3 = x.reshape(B, C, H * W).transpose(0, 2, 1)            # (B, HW, C)
    mu = jnp.mean(x3, axis=-1, keepdims=True)
    var = jnp.mean((x3 - mu) ** 2, axis=-1, keepdims=True)
    if layer_norm_type == "WithBias":
        y = (x3 - mu) / jnp.sqrt(var + EPS) * w + b
    else:
        y = x3 / jnp.sqrt(var + EPS) * w
    return y.transpose(0, 2, 1).reshape(B, C, H, W)


# ----------------------------------- demo ------------------------------------

if __name__ == "__main__":
    key = jax.random.PRNGKey(0)
    kx, kw, kb, kx2 = jax.random.split(key, 4)

    B, C, H, W = 2, 48, 16, 16
    x = jax.random.normal(kx, (B, C, H, W), jnp.float32)
    w = 1.0 + 0.05 * jax.random.normal(kw, (C,), jnp.float32)
    b = 0.05 * jax.random.normal(kb, (C,), jnp.float32)

    # WithBias LayerNorm (the common 'else' branch of the module).
    fwd_wb = jax.jit(functools.partial(layer_norm, layer_norm_type="WithBias"))
    out = jax.block_until_ready(fwd_wb(x, w, b))
    assert out.shape == (B, C, H, W)
    assert bool(jnp.all(jnp.isfinite(out)))
    ref = _layer_norm_ref(x, w, b, "WithBias")
    assert bool(jnp.allclose(out, ref, rtol=1e-4, atol=1e-4))

    # BiasFree LayerNorm with a non-multiple-of-128 pixel count (H*W = 264).
    x2 = jax.random.normal(kx2, (2, C, 12, 22), jnp.float32)
    fwd_bf = jax.jit(functools.partial(layer_norm, layer_norm_type="BiasFree"))
    out2 = jax.block_until_ready(fwd_bf(x2, w))
    assert out2.shape == x2.shape
    assert bool(jnp.all(jnp.isfinite(out2)))
    ref2 = _layer_norm_ref(x2, w, None, "BiasFree")
    assert bool(jnp.allclose(out2, ref2, rtol=1e-4, atol=1e-4))

    print("KERNEL_OK")
</pallas_src>

<mosaic_0001>
module attributes {stable_mosaic.version = 11 : i64} {
  func.func @_ln_withbias_kernel(%arg0: i32, %arg1: i32, %arg2: memref<1x48x256xf32, #tpu.memory_space<vmem>>, %arg3: memref<48x1xf32, #tpu.memory_space<vmem>>, %arg4: memref<48x1xf32, #tpu.memory_space<vmem>>, %arg5: memref<1x48x256xf32, #tpu.memory_space<vmem>>) attributes {dimension_semantics = [#tpu.dimension_semantics<parallel>, #tpu.dimension_semantics<parallel>], iteration_bounds = array<i64: 2, 1>, scalar_prefetch = 0 : i64, scratch_operands = 0 : i64, tpu.core_type = #tpu.core_type<tc>, window_params = [{transform_indices = @transform_0, window_bounds = array<i64: 1, 48, 256>}, {pipeline_mode = #tpu.pipeline_mode<synchronous>, transform_indices = @transform_1, window_bounds = array<i64: 48, 1>}, {pipeline_mode = #tpu.pipeline_mode<synchronous>, transform_indices = @transform_2, window_bounds = array<i64: 48, 1>}, {transform_indices = @transform_3, window_bounds = array<i64: 1, 48, 256>}]} {
    %c0 = arith.constant 0 : index
    %c0_0 = arith.constant 0 : index
    %c0_1 = arith.constant 0 : index
    %0 = vector.load %arg2[%c0, %c0_0, %c0_1] : memref<1x48x256xf32, #tpu.memory_space<vmem>>, vector<1x48x256xf32>
    %cst = arith.constant dense<0.000000e+00> : vector<1x256xf32>
    %1 = vector.multi_reduction <add>, %0, %cst [1] : vector<1x48x256xf32> to vector<1x256xf32>
    %2 = vector.shape_cast %1 : vector<1x256xf32> to vector<1x1x256xf32>
    %cst_2 = arith.constant 0.020833334 : f32
    %3 = vector.broadcast %cst_2 : f32 to vector<1x1x256xf32>
    %4 = arith.mulf %2, %3 : vector<1x1x256xf32>
    %5 = arith.mulf %0, %0 : vector<1x48x256xf32>
    %cst_3 = arith.constant dense<0.000000e+00> : vector<1x256xf32>
    %6 = vector.multi_reduction <add>, %5, %cst_3 [1] : vector<1x48x256xf32> to vector<1x256xf32>
    %7 = vector.shape_cast %6 : vector<1x256xf32> to vector<1x1x256xf32>
    %cst_4 = arith.constant 0.020833334 : f32
    %8 = vector.broadcast %cst_4 : f32 to vector<1x1x256xf32>
    %9 = arith.mulf %7, %8 : vector<1x1x256xf32>
    %10 = arith.mulf %4, %4 : vector<1x1x256xf32>
    %11 = arith.subf %9, %10 : vector<1x1x256xf32>
    %12 = vector.broadcast %4 : vector<1x1x256xf32> to vector<1x48x256xf32>
    %13 = arith.subf %0, %12 : vector<1x48x256xf32>
    %cst_5 = arith.constant 9.99999974E-6 : f32
    %14 = vector.broadcast %cst_5 : f32 to vector<1x1x256xf32>
    %15 = arith.addf %11, %14 : vector<1x1x256xf32>
    %16 = math.rsqrt %15 : vector<1x1x256xf32>
    %17 = vector.broadcast %16 : vector<1x1x256xf32> to vector<1x48x256xf32>
    %18 = arith.mulf %13, %17 : vector<1x48x256xf32>
    %c0_6 = arith.constant 0 : index
    %c0_7 = arith.constant 0 : index
    %19 = vector.load %arg3[%c0_6, %c0_7] : memref<48x1xf32, #tpu.memory_space<vmem>>, vector<48x1xf32>
    %c0_8 = arith.constant 0 : index
    %c0_9 = arith.constant 0 : index
    %20 = vector.load %arg4[%c0_8, %c0_9] : memref<48x1xf32, #tpu.memory_space<vmem>>, vector<48x1xf32>
    %21 = vector.shape_cast %19 : vector<48x1xf32> to vector<1x48x1xf32>
    %22 = vector.broadcast %21 : vector<1x48x1xf32> to vector<1x48x256xf32>
    %23 = arith.mulf %18, %22 : vector<1x48x256xf32>
    %24 = vector.shape_cast %20 : vector<48x1xf32> to vector<1x48x1xf32>
    %25 = vector.broadcast %24 : vector<1x48x1xf32> to vector<1x48x256xf32>
    %26 = arith.addf %23, %25 : vector<1x48x256xf32>
    %c0_10 = arith.constant 0 : index
    %c0_11 = arith.constant 0 : index
    %c0_12 = arith.constant 0 : index
    %27 = vector.load %arg5[%c0_10, %c0_11, %c0_12] : memref<1x48x256xf32, #tpu.memory_space<vmem>>, vector<1x48x256xf32>
    tpu.vector_store %arg5[%c0_10, %c0_11, %c0_12], %26 {strides = array<i32>} : memref<1x48x256xf32, #tpu.memory_space<vmem>>, vector<1x48x256xf32>,
    return
  }
  func.func @transform_0(%arg0: i32, %arg1: i32) -> (i32, i32, i32) {
    %c0_i32 = arith.constant 0 : i32
    %c0_i32_0 = arith.constant 0 : i32
    return %arg0, %c0_i32, %arg1 : i32, i32, i32
  }
  func.func @transform_1(%arg0: i32, %arg1: i32) -> (i32, i32) {
    %c0_i32 = arith.constant 0 : i32
    %c0_i32_0 = arith.constant 0 : i32
    %c0_i32_1 = arith.constant 0 : i32
    return %c0_i32, %c0_i32_0 : i32, i32
  }
  func.func @transform_2(%arg0: i32, %arg1: i32) -> (i32, i32) {
    %c0_i32 = arith.constant 0 : i32
    %c0_i32_0 = arith.constant 0 : i32
    %c0_i32_1 = arith.constant 0 : i32
    return %c0_i32, %c0_i32_0 : i32, i32
  }
  func.func @transform_3(%arg0: i32, %arg1: i32) -> (i32, i32, i32) {
    %c0_i32 = arith.constant 0 : i32
    %c0_i32_0 = arith.constant 0 : i32
    return %arg0, %c0_i32, %arg1 : i32, i32, i32
  }
}

</mosaic_0001>

<bundles_post_ra>
// kernel: layer_norm.1
= control target key start
LH: loop header
LB: loop body
LE: loop exit
PB: predicated region body
PF: predicated region fallthrough
CT: control target
= control target key end

     0   :  { %s614_s12 = smov 0   ;;  %s616_s13 = smov 0   ;;  %s818_s0 = inlined_call_operand.vmem [shape: f32[2,48,256], index: 0, kind: input, shape index: {}]   ;;  %s819_s1 = inlined_call_operand.vmem [shape: f32[48,1], index: 1, kind: input, shape index: {}]   ;;  %s820_s2 = inlined_call_operand.vmem [shape: f32[48,1], index: 2, kind: input, shape index: {}]   ;;  %s821_s3 = inlined_call_operand.vmem [shape: f32[2,48,256], index: 3, kind: output, shape index: {}]  }
   0x1   :  { %s618_s14 = smov 0  }
   0x2 LB: > { %s25_s15 = sadd.s32 1, %s587_s13  ;;  %p531_p0 = scmp.ge.s32.totalorder %s591_s14, 1  ;;  %s591_s14 = sphi %s618_s14, %s13_s14   ;;  %s587_s13 = sphi %s616_s13, %s823_s13   ;;  %s583_s12 = sphi %s614_s12, %s822_s12  }
   0x3   : > { %p27_p1 = scmp.ge.s32.totalorder %s25_s15, 2  ;;  %p158_p2 = scmp.lt.s32.totalorder %s591_s14, 3 }
   0x5   : > { %s825_s15 = smov (%p27_p1, %s25_s15), 0  ;;  %p159_p3 = pnand %p531_p0, %p158_p2 }
   0x6   : > { %p191_p4 = scmp.lt.s32.totalorder (!%p159_p3), %s583_s12, 1 }
   0x7   : > { %162 = sbr.rel (%p159_p3) target bundleno = 160 (0xa0), region = 32 }
   0xc   : > { %v336_v0 = vld [vmem:[%s819_s1 + $0x20] sm:$0xff]  ;;  %v334_v1 = vld [vmem:[%s819_s1 + $0x10] sm:$0xff]  ;;  %v593_v3 = vmov 0   ;;  %v337_v4 = vld [vmem:[%s819_s1 + $0x28] sm:$0xff]  ;;  %s827_s12 = smov (!%p191_p4, %s583_s12), 1 }
   0xd   : > { %v332_v2 = vld [vmem:[%s819_s1] sm:$0xff]  ;;  %564 = vset.pattern.permute.xlu2 %v593_v3  ;;  %563 = vset.pattern.permute.xlu1 %v593_v3  ;;  %v335_v5 = vld [vmem:[%s819_s1 + $0x18] sm:$0xff]  ;;  %v333_v6 = vld [vmem:[%s819_s1 + $0x8] sm:$0xff]  ;;  %s536_s17 = smul.u32 96, %s827_s12 }
   0xe   : > { %562 = vset.pattern.permute.xlu0 %v593_v3  ;;  %366 = vperm.xlu2 %564, %v336_v0   ;;  %v340_v7 = vld [vmem:[%s820_s2 + $0x10] sm:$0xff]  ;;  %v339_v8 = vld [vmem:[%s820_s2 + $0x8] sm:$0xff]  ;;  %v338_v9 = vld [vmem:[%s820_s2] sm:$0xff] }
   0xf   : > { %356 = vperm.xlu1 %563, %v334_v1   ;;  %346 = vperm.xlu0 %562, %v332_v2   ;;  %v343_v10 = vld [vmem:[%s820_s2 + $0x28] sm:$0xff]  ;;  %v342_v11 = vld [vmem:[%s820_s2 + $0x20] sm:$0xff]  ;;  %v341_v12 = vld [vmem:[%s820_s2 + $0x18] sm:$0xff]  ;;  %s680_s20 = scalar_lea.vmem %s818_s0, %s536_s17  ;;  %s777_s23 = scalar_lea.vmem %s821_s3, %s536_s17 }
  0x10   : > { %v683_v13 = vld [vmem:[%s680_s20] sm:$0xff]  ;;  %v686_v14 = vld [vmem:[%s680_s20 + $0x8] sm:$0xff]  ;;  %v689_v15 = vld [vmem:[%s680_s20 + $0x10] sm:$0xff] }
  0x11   : > { %v692_v16 = vld [vmem:[%s680_s20 + $0x18] sm:$0xff]  ;;  %v222_v17 = vadd.f32 %v689_v15, %v683_v13  ;;  %v246_v18 = vmul.f32 %v683_v13, %v683_v13  ;;  %v247_v19 = vmul.f32 %v686_v14, %v686_v14  ;;  %v248_v20 = vmul.f32 %v689_v15, %v689_v15  ;;  %v703_v21 = vld [vmem:[%s680_s20 + $0x20] sm:$0xff]  ;;  %v706_v22 = vld [vmem:[%s680_s20 + $0x28] sm:$0xff] }
  0x12   : > { %v233_v23 = vadd.f32 %v692_v16, %v686_v14  ;;  %v249_v24 = vmul.f32 %v692_v16, %v692_v16  ;;  %v250_v26 = vmul.f32 %v703_v21, %v703_v21  ;;  %v251_v27 = vmul.f32 %v706_v22, %v706_v22  ;;  %v718_v29 = vld [vmem:[%s680_s20 + $0x30] sm:$0xff]  ;;  %v721_v30 = vld [vmem:[%s680_s20 + $0x38] sm:$0xff]  ;;  %v730_v37 = vld [vmem:[%s680_s20 + $0x40] sm:$0xff] }
  0x13   : > { %v223_v25 = vadd.f32 %v222_v17, %v703_v21  ;;  %v258_v28 = vadd.f32 %v248_v20, %v246_v18  ;;  %v252_v34 = vmul.f32 %v718_v29, %v718_v29  ;;  %v253_v35 = vmul.f32 %v721_v30, %v721_v30  ;;  %v733_v38 = vld [vmem:[%s680_s20 + $0x48] sm:$0xff]  ;;  %v742_v45 = vld [vmem:[%s680_s20 + $0x50] sm:$0xff]  ;;  %v745_v46 = vld [vmem:[%s680_s20 + $0x58] sm:$0xff] }
  0x14   : > { %v234_v31 = vadd.f32 %v233_v23, %v706_v22  ;;  %v269_v32 = vadd.f32 %v249_v24, %v247_v19  ;;  %v254_v42 = vmul.f32 %v730_v37, %v730_v37  ;;  %v255_v43 = vmul.f32 %v733_v38, %v733_v38 }
  0x15   : > { %v224_v33 = vadd.f32 %v223_v25, %v718_v29  ;;  %v259_v36 = vadd.f32 %v258_v28, %v250_v26  ;;  %v256_v50 = vmul.f32 %v742_v45, %v742_v45  ;;  %v257_v51 = vmul.f32 %v745_v46, %v745_v46 }
  0x16   : > { %371 = vperm.xlu2 %564, %v337_v4   ;;  %v235_v39 = vadd.f32 %v234_v31, %v721_v30  ;;  %v270_v40 = vadd.f32 %v269_v32, %v251_v27 }
  0x17   : > { %361 = vperm.xlu1 %563, %v335_v5   ;;  %351 = vperm.xlu0 %562, %v333_v6   ;;  %v225_v41 = vadd.f32 %v224_v33, %v730_v37  ;;  %v260_v44 = vadd.f32 %v259_v36, %v252_v34 }
  0x18   : > { %v236_v47 = vadd.f32 %v235_v39, %v733_v38  ;;  %v271_v48 = vadd.f32 %v270_v40, %v253_v35 }
  0x19   : > { %v226_v49 = vadd.f32 %v225_v41, %v742_v45  ;;  %v261_v52 = vadd.f32 %v260_v44, %v254_v42 }
  0x1a   : > { %v237_v53 = vadd.f32 %v236_v47, %v745_v46  ;;  %v272_v54 = vadd.f32 %v271_v48, %v255_v43 }
  0x1b   : > { %v227_v55 = vrot.slane %v226_v49, 4  ;;  %v262_v56 = vadd.f32 %v261_v52, %v256_v50 }
  0x1c   : > { %v238_v57 = vrot.slane %v237_v53, 4  ;;  %v273_v58 = vadd.f32 %v272_v54, %v257_v51 }
  0x1d   : > { %v228_v59 = vadd.f32 %v227_v55, %v226_v49  ;;  %v263_v60 = vrot.slane %v262_v56, 4 }
  0x1e   : > { %398 = vperm.xlu2 %564, %v340_v7   ;;  %v239_v61 = vadd.f32 %v238_v57, %v237_v53  ;;  %v274_v62 = vrot.slane %v273_v58, 4 }
  0x1f   : > { %393 = vperm.xlu1 %563, %v339_v8   ;;  %388 = vperm.xlu0 %562, %v338_v9   ;;  %v229_v63 = vrot.slane %v228_v59, 2  ;;  %v264_v0 = vadd.f32 %v263_v60, %v262_v56 }
  0x20   : > { %v240_v1 = vrot.slane %v239_v61, 2  ;;  %v275_v2 = vadd.f32 %v274_v62, %v273_v58 }
  0x21   : > { %v230_v3 = vadd.f32 %v229_v63, %v228_v59  ;;  %v265_v4 = vrot.slane %v264_v0, 2 }
  0x22   : > { %v241_v5 = vadd.f32 %v240_v1, %v239_v61  ;;  %v276_v6 = vrot.slane %v275_v2, 2 }
  0x23   : > { %v231_v7 = vrot.slane %v230_v3, 1  ;;  %v266_v8 = vadd.f32 %v265_v4, %v264_v0 }
  0x24   : > { %v242_v9 = vrot.slane %v241_v5, 1 }
  0x26   : > { %413 = vperm.xlu2 %564, %v343_v10   ;;  %v277_v10 = vadd.f32 %v276_v6, %v275_v2  ;;  %v243_v17 = vadd.f32 %v242_v9, %v241_v5 }
  0x27   : > { %408 = vperm.xlu1 %563, %v342_v11   ;;  %403 = vperm.xlu0 %562, %v341_v12   ;;  %v232_v11 = vadd.f32 %v231_v7, %v230_v3  ;;  %v267_v12 = vrot.slane %v266_v8, 1 }
  0x28   : > { %v278_v18 = vrot.slane %v277_v10, 1  ;;  %v756_v23 = vmul.f32 0.020833334, %v243_v17 }
  0x29   : > { %v754_v19 = vmul.f32 0.020833334, %v232_v11  ;;  %v268_v20 = vadd.f32 %v267_v12, %v266_v8 }
  0x2a   : > { %v279_v24 = vadd.f32 %v278_v18, %v277_v10  ;;  %v283_v28 = vmul.f32 %v756_v23, %v756_v23  ;;  %v297_v54 = vsub.f32 %v745_v46, %v756_v23  ;;  %v291_v61 = vsub.f32 %v706_v22, %v756_v23 }
  0x2b   : > { %v280_v25 = vmul.f32 0.020833334, %v268_v20  ;;  %v282_v26 = vmul.f32 %v754_v19, %v754_v19  ;;  %v296_v53 = vsub.f32 %v742_v45, %v754_v19  ;;  %v290_v60 = vsub.f32 %v703_v21, %v754_v19 }
  0x2c   : > { %v281_v27 = vmul.f32 0.020833334, %v279_v24  ;;  %v286_v7 = vsub.f32 %v683_v13, %v754_v19  ;;  %v288_v8 = vsub.f32 %v689_v15, %v754_v19  ;;  %v289_v9 = vsub.f32 %v692_v16, %v756_v23 }
  0x2d   : > { %v284_v31 = vsub.f32 %v280_v25, %v282_v26  ;;  %v287_v10 = vsub.f32 %v686_v14, %v756_v23  ;;  %v294_v25 = vsub.f32 %v730_v37, %v754_v19  ;;  %v295_v13 = vsub.f32 %v733_v38, %v756_v23 }
  0x2e   : > { %v285_v32 = vsub.f32 %v281_v27, %v283_v28  ;;  %v292_v16 = vsub.f32 %v718_v29, %v754_v19  ;;  %v293_v28 = vsub.f32 %v721_v30, %v756_v23 }
  0x2f   : > { %v298_v33 = vadd.f32 1e-05, %v284_v31 }
  0x30   : > { %v299_v34 = vadd.f32 1e-05, %v285_v32 }
  0x31   : > { %565 = vrsqrt.f32 %v298_v33  ;;  %vm306_vm0 = vweird.f32 %v298_v33 }
  0x32   : > { %567 = vrsqrt.f32 %v299_v34  ;;  %vm316_vm2 = vweird.f32 %v299_v34 }
  0x37   : > { %v566_v35 = vpop.eup %565 }
  0x38   : > { %v568_v36 = vpop.eup %567  ;;  %v301_v39 = vmul.f32 %v566_v35, %v298_v33  ;;  %vm307_vm1 = vweird.f32 %v566_v35 }
  0x39   : > { %v311_v40 = vmul.f32 %v568_v36, %v299_v34  ;;  %vm317_vm3 = vweird.f32 %v568_v36  ;;  %vm308_vm4 = vmor %vm306_vm0, %vm307_vm1 }
  0x3a   : > { %v302_v41 = vmul.f32 %v566_v35, %v301_v39  ;;  %vm318_vm5 = vmor %vm316_vm2, %vm317_vm3 }
  0x3b   : > { %v312_v42 = vmul.f32 %v568_v36, %v311_v40 }
  0x3c   : > { %v303_v44 = vmul.f32 0.5, %v302_v41 }
  0x3d   : > { %v313_v47 = vmul.f32 0.5, %v312_v42 }
  0x3e   : > { %v304_v48 = vsub.f32 1.5, %v303_v44 }
  0x3f   : > { %v314_v49 = vsub.f32 1.5, %v313_v47 }
  0x40   : > { %v305_v51 = vmul.f32 %v566_v35, %v304_v48 }
  0x41   : > { %v315_v52 = vmul.f32 %v568_v36, %v314_v49 }
  0x42   : > { %v309_v55 = vsel %vm308_vm4, %v566_v35, %v305_v51 }
  0x43   : > { %v319_v56 = vsel %vm318_vm5, %v568_v36, %v315_v52  ;;  %v330_v58 = vmul.f32 %v309_v55, %v296_v53  ;;  %v324_v0 = vmul.f32 %v309_v55, %v290_v60  ;;  %v320_v17 = vmul.f32 %v309_v55, %v286_v7 }
  0x44   : > { %v331_v59 = vmul.f32 %v319_v56, %v297_v54  ;;  %v325_v1 = vmul.f32 %v319_v56, %v291_v61  ;;  %v322_v18 = vmul.f32 %v309_v55, %v288_v8  ;;  %v323_v20 = vmul.f32 %v319_v56, %v289_v9 }
  0x45   : > { %v321_v24 = vmul.f32 %v319_v56, %v287_v10  ;;  %v328_v35 = vmul.f32 %v309_v55, %v294_v25  ;;  %v329_v36 = vmul.f32 %v319_v56, %v295_v13  ;;  %v326_v39 = vmul.f32 %v309_v55, %v292_v16 }
  0x46   : > { %v327_v29 = vmul.f32 %v319_v56, %v293_v28 }
  0x68   : > { %v762_v43 = vpop.permute.xlu2 %366 }
  0x69   : > { %v382_v30 = vmul.f32 %v762_v43, %v328_v35  ;;  %v383_v19 = vmul.f32 %v762_v43, %v329_v36 }
  0x70   : > { %v372_v50 = vpop.permute.xlu2 %371 }
  0x71   : > { %v384_v62 = vmul.f32 %v372_v50, %v330_v58  ;;  %v385_v63 = vmul.f32 %v372_v50, %v331_v59 }
  0x78   : > { %v399_v57 = vpop.permute.xlu2 %398 }
  0x80   : > { %v414_v2 = vpop.permute.xlu2 %413 }
  0x81   : > { %v426_v45 = vadd.f32 %v414_v2, %v384_v62  ;;  %v427_v21 = vadd.f32 %v414_v2, %v385_v63  ;;  %v357_v46 = vpop.permute.xlu1 %356  ;;  %v347_v3 = vpop.permute.xlu0 %346 }
  0x82   : > { %v378_v22 = vmul.f32 %v357_v46, %v324_v0  ;;  %v379_v4 = vmul.f32 %v357_v46, %v325_v1  ;;  %v374_v15 = vmul.f32 %v347_v3, %v320_v17  ;;  %v375_v27 = vmul.f32 %v347_v3, %v321_v24 }
  0x83   : > { %438 = vst [vmem:[%s777_s23 + $0x50] sm:$0xff] %v426_v45 }
  0x84   : > { %439 = vst [vmem:[%s777_s23 + $0x58] sm:$0xff] %v427_v21  ;;  %v420_v5 = vadd.f32 %v399_v57, %v378_v22  ;;  %v421_v6 = vadd.f32 %v399_v57, %v379_v4 }
  0x86   : > { %432 = vst [vmem:[%s777_s23 + $0x20] sm:$0xff] %v420_v5 }
  0x87   : > { %433 = vst [vmem:[%s777_s23 + $0x28] sm:$0xff] %v421_v6 }
  0x89   : > { %v362_v11 = vpop.permute.xlu1 %361  ;;  %v352_v12 = vpop.permute.xlu0 %351 }
  0x8a   : > { %v376_v26 = vmul.f32 %v352_v12, %v322_v18  ;;  %v377_v14 = vmul.f32 %v352_v12, %v323_v20  ;;  %v380_v23 = vmul.f32 %v362_v11, %v326_v39  ;;  %v381_v40 = vmul.f32 %v362_v11, %v327_v29 }
  0x91   : > { %v394_v31 = vpop.permute.xlu1 %393  ;;  %v389_v32 = vpop.permute.xlu0 %388 }
  0x92   : > { %v418_v37 = vadd.f32 %v394_v31, %v376_v26  ;;  %v419_v33 = vadd.f32 %v394_v31, %v377_v14  ;;  %v416_v34 = vadd.f32 %v389_v32, %v374_v15  ;;  %v417_v38 = vadd.f32 %v389_v32, %v375_v27 }
  0x94   : > { %430 = vst [vmem:[%s777_s23 + $0x10] sm:$0xff] %v418_v37 }
  0x95   : > { %431 = vst [vmem:[%s777_s23 + $0x18] sm:$0xff] %v419_v33 }
  0x96   : > { %428 = vst [vmem:[%s777_s23] sm:$0xff] %v416_v34 }
  0x97   : > { %429 = vst [vmem:[%s777_s23 + $0x8] sm:$0xff] %v417_v38 }
  0x99   : > { %v409_v41 = vpop.permute.xlu1 %408  ;;  %v404_v42 = vpop.permute.xlu0 %403 }
  0x9a   : > { %v424_v44 = vadd.f32 %v409_v41, %v382_v30  ;;  %v425_v47 = vadd.f32 %v409_v41, %v383_v19  ;;  %v422_v48 = vadd.f32 %v404_v42, %v380_v23  ;;  %v423_v49 = vadd.f32 %v404_v42, %v381_v40 }
  0x9c   : > { %436 = vst [vmem:[%s777_s23 + $0x40] sm:$0xff] %v424_v44 }
  0x9d   : > { %437 = vst [vmem:[%s777_s23 + $0x48] sm:$0xff] %v425_v47 }
  0x9e   : > { %434 = vst [vmem:[%s777_s23 + $0x30] sm:$0xff] %v422_v48 }
  0x9f   : > { %435 = vst [vmem:[%s777_s23 + $0x38] sm:$0xff] %v423_v49 }
  0xa0 PF: > { %s13_s14 = sadd.s32 1, %s591_s14   ;;  %s822_s12 = smov %s587_s13 }
  0xa1   : > { %p10_p5 = scmp.ge.s32.totalorder %s13_s14, 4   ;;  %s823_s13 = smov %s825_s15 }
  0xa3   :  { %12 = sbr.rel (!%p10_p5) target bundleno = 2 (0x2), region = 62 }

</bundles_post_ra>
